<compile_context>
chip_gen: v5e
topology: v5e:2x2
jax: 0.10.0
libtpu: 0.0.40
codegen_flags: <defaults>
</compile_context>

<pallas_src>
import jax
import jax.numpy as jnp
from jax.experimental import pallas as pl
from jax.experimental.pallas import tpu as pltpu


def _mlp_kernel(z_ref, a_ref, w1z_ref, w1a_ref, b1_ref,
                w2_ref, b2_ref, w3_ref, b3_ref, o_ref):
    # Layer 1: relu(z @ w1_z + a @ w1_a + b1)  ==  relu(concat(z, a) @ w1 + b1)
    z = z_ref[...].astype(jnp.bfloat16)
    a = a_ref[...].astype(jnp.bfloat16)
    h1 = (jnp.dot(z, w1z_ref[...], preferred_element_type=jnp.float32)
          + jnp.dot(a, w1a_ref[...], preferred_element_type=jnp.float32)
          + b1_ref[...])
    h1 = jnp.maximum(h1, 0.0).astype(jnp.bfloat16)

    # Layer 2: relu(h1 @ w2 + b2)
    h2 = jnp.dot(h1, w2_ref[...], preferred_element_type=jnp.float32) + b2_ref[...]
    h2 = jnp.maximum(h2, 0.0).astype(jnp.bfloat16)

    # Layer 3: h2 @ w3 + b3
    out = jnp.dot(h2, w3_ref[...], preferred_element_type=jnp.float32) + b3_ref[...]
    o_ref[...] = out.astype(o_ref.dtype)


def _resident_spec(shape):
    """Weight/bias spec: constant index_map -> DMA'd once, VMEM-resident.

    pipeline_mode=pl.Buffered(1) avoids double-buffering a block that never
    changes (keeps VMEM headroom if hidden_dim / tile size is scaled up).
    Falls back to the plain spec on jax versions without pipeline_mode.
    """
    index_map = lambda i: (0, 0)
    try:
        return pl.BlockSpec(shape, index_map, pipeline_mode=pl.Buffered(1))
    except TypeError:
        return pl.BlockSpec(shape, index_map)


def latent_dynamics_forward(z_t, a_t, params, *, block_b=512):
    """Pallas forward pass. z_t: (B, latent_dim) f32, a_t: (B, action_dim) f32."""
    w1_z, w1_a = params["w1_z"], params["w1_a"]
    b1, w2, b2, w3, b3 = (params["b1"], params["w2"], params["b2"],
                          params["w3"], params["b3"])

    B, latent_dim = z_t.shape
    action_dim = a_t.shape[1]
    hidden_dim = w2.shape[0]
    out_dim = w3.shape[1]

    # ---- batch tile selection (no wrapper-side padding) -------------------
    # Tiny batch: one full-array block (legal: block_shape == array dims).
    # Small/medium batch: aim for exactly 2 tiles so both v7x TensorCores get
    # work; tile rows kept a multiple of 8.
    # Large batch: block_b rows per step (big enough to hide per-step overhead).
    if B <= 16:
        tb = B
    elif B <= 2 * block_b:
        tb = ((pl.cdiv(B, 2) + 7) // 8) * 8
    else:
        tb = block_b
    nb = pl.cdiv(B, tb)
    # Ragged edge block (nb*tb > B) is handled by Mosaic: out-of-bounds rows
    # are garbage in, masked out on store -- safe because compute is
    # row-independent.

    out = pl.pallas_call(
        _mlp_kernel,
        out_shape=jax.ShapeDtypeStruct((B, out_dim), z_t.dtype),
        grid=(nb,),
        in_specs=[
            pl.BlockSpec((tb, latent_dim), lambda i: (i, 0)),   # z tile
            pl.BlockSpec((tb, action_dim), lambda i: (i, 0)),   # a tile
            _resident_spec((latent_dim, hidden_dim)),           # w1_z (bf16)
            _resident_spec((action_dim, hidden_dim)),           # w1_a (bf16)
            _resident_spec((1, hidden_dim)),                    # b1   (f32)
            _resident_spec((hidden_dim, hidden_dim)),           # w2   (bf16)
            _resident_spec((1, hidden_dim)),                    # b2   (f32)
            _resident_spec((hidden_dim, out_dim)),              # w3   (bf16)
            _resident_spec((1, out_dim)),                       # b3   (f32)
        ],
        out_specs=pl.BlockSpec((tb, out_dim), lambda i: (i, 0)),
        compiler_params=pltpu.CompilerParams(
            dimension_semantics=("parallel",)),
    )(z_t, a_t, w1_z, w1_a, b1, w2, b2, w3, b3)

    return out


def init_params(latent_dim, action_dim, hidden_dim, key):
    """Parameter init mirroring nn.Linear shapes.

    PyTorch nn.Linear stores weight as (out, in); we store the transpose
    (in, out) so the kernel does x @ W directly.  The first layer's weight is
    pre-split along its input axis into a latent part and an action part
    (equivalent to concat(z, a) @ w1).  Weights are kept in bf16 (MXU-native
    on v5e/v6e/v7x); biases stay f32 and are 2-D (1, out) for clean TPU
    broadcasting.
    """
    in_dim = latent_dim + action_dim
    ks = jax.random.split(key, 6)

    def linear(kw, kb, fan_in, fan_out):
        bound = 1.0 / jnp.sqrt(fan_in)
        w = jax.random.uniform(kw, (fan_in, fan_out), jnp.float32, -bound, bound)
        b = jax.random.uniform(kb, (1, fan_out), jnp.float32, -bound, bound)
        return w.astype(jnp.bfloat16), b

    w1, b1 = linear(ks[0], ks[1], in_dim, hidden_dim)
    w2, b2 = linear(ks[2], ks[3], hidden_dim, hidden_dim)
    w3, b3 = linear(ks[4], ks[5], hidden_dim, latent_dim)
    return {
        "w1_z": w1[:latent_dim], "w1_a": w1[latent_dim:], "b1": b1,
        "w2": w2, "b2": b2, "w3": w3, "b3": b3,
    }


def reference_forward(z_t, a_t, params):
    """Pure-JAX f32 reference using the same (bf16) weights."""
    w1 = jnp.concatenate([params["w1_z"], params["w1_a"]], axis=0).astype(jnp.float32)
    w2 = params["w2"].astype(jnp.float32)
    w3 = params["w3"].astype(jnp.float32)
    x = jnp.concatenate([z_t, a_t], axis=-1)
    h1 = jnp.maximum(x @ w1 + params["b1"], 0.0)
    h2 = jnp.maximum(h1 @ w2 + params["b2"], 0.0)
    return h2 @ w3 + params["b3"]


if __name__ == "__main__":
    latent_dim, action_dim, hidden_dim = 32, 8, 256   # hidden = module default

    key = jax.random.PRNGKey(0)
    k_params, k_z, k_a = jax.random.split(key, 3)
    params = init_params(latent_dim, action_dim, hidden_dim, k_params)

    # Case 1: batch that exercises two tiles plus a masked ragged edge block
    # (B=200 -> tb=104, nb=2, second block only partially in-bounds).
    batch = 200
    z_t = jax.random.normal(k_z, (batch, latent_dim), jnp.float32)
    a_t = jax.random.normal(k_a, (batch, action_dim), jnp.float32)
    out = jax.block_until_ready(latent_dynamics_forward(z_t, a_t, params))
    ref = reference_forward(z_t, a_t, params)
    assert out.shape == (batch, latent_dim)
    assert jnp.allclose(out, ref, atol=3e-2, rtol=3e-2), "mismatch vs reference (B=200)"

    # Case 2: tiny batch -- single full-array block, no padding anywhere.
    small_b = 3
    z_s = z_t[:small_b]
    a_s = a_t[:small_b]
    out_s = jax.block_until_ready(latent_dynamics_forward(z_s, a_s, params))
    ref_s = reference_forward(z_s, a_s, params)
    assert out_s.shape == (small_b, latent_dim)
    assert jnp.allclose(out_s, ref_s, atol=3e-2, rtol=3e-2), "mismatch vs reference (B=3)"

    print("KERNEL_OK")
</pallas_src>

<mosaic_0001>
module attributes {stable_mosaic.version = 11 : i64} {
  func.func @_mlp_kernel(%arg0: i32, %arg1: memref<104x32xf32, #tpu.memory_space<vmem>>, %arg2: memref<104x8xf32, #tpu.memory_space<vmem>>, %arg3: memref<32x256xbf16, #tpu.memory_space<vmem>>, %arg4: memref<8x256xbf16, #tpu.memory_space<vmem>>, %arg5: memref<1x256xf32, #tpu.memory_space<vmem>>, %arg6: memref<256x256xbf16, #tpu.memory_space<vmem>>, %arg7: memref<1x256xf32, #tpu.memory_space<vmem>>, %arg8: memref<256x32xbf16, #tpu.memory_space<vmem>>, %arg9: memref<1x32xf32, #tpu.memory_space<vmem>>, %arg10: memref<104x32xf32, #tpu.memory_space<vmem>>) attributes {dimension_semantics = [#tpu.dimension_semantics<parallel>], iteration_bounds = array<i64: 2>, scalar_prefetch = 0 : i64, scratch_operands = 0 : i64, tpu.core_type = #tpu.core_type<tc>, window_params = [{transform_indices = @transform_0, window_bounds = array<i64: 104, 32>}, {transform_indices = @transform_1, window_bounds = array<i64: 104, 8>}, {pipeline_mode = #tpu.pipeline_mode<synchronous>, transform_indices = @transform_2, window_bounds = array<i64: 32, 256>}, {pipeline_mode = #tpu.pipeline_mode<synchronous>, transform_indices = @transform_3, window_bounds = array<i64: 8, 256>}, {pipeline_mode = #tpu.pipeline_mode<synchronous>, transform_indices = @transform_4, window_bounds = array<i64: 1, 256>}, {pipeline_mode = #tpu.pipeline_mode<synchronous>, transform_indices = @transform_5, window_bounds = array<i64: 256, 256>}, {pipeline_mode = #tpu.pipeline_mode<synchronous>, transform_indices = @transform_6, window_bounds = array<i64: 1, 256>}, {pipeline_mode = #tpu.pipeline_mode<synchronous>, transform_indices = @transform_7, window_bounds = array<i64: 256, 32>}, {pipeline_mode = #tpu.pipeline_mode<synchronous>, transform_indices = @transform_8, window_bounds = array<i64: 1, 32>}, {transform_indices = @transform_9, window_bounds = array<i64: 104, 32>}]} {
    %c0 = arith.constant 0 : index
    %c0_0 = arith.constant 0 : index
    %0 = vector.load %arg1[%c0, %c0_0] : memref<104x32xf32, #tpu.memory_space<vmem>>, vector<104x32xf32>
    %1 = arith.truncf %0 : vector<104x32xf32> to vector<104x32xbf16>
    %c0_1 = arith.constant 0 : index
    %c0_2 = arith.constant 0 : index
    %2 = vector.load %arg2[%c0_1, %c0_2] : memref<104x8xf32, #tpu.memory_space<vmem>>, vector<104x8xf32>
    %3 = arith.truncf %2 : vector<104x8xf32> to vector<104x8xbf16>
    %c0_3 = arith.constant 0 : index
    %c0_4 = arith.constant 0 : index
    %4 = vector.load %arg3[%c0_3, %c0_4] : memref<32x256xbf16, #tpu.memory_space<vmem>>, vector<32x256xbf16>
    %cst = arith.constant dense<0.000000e+00> : vector<104x256xf32>
    %5 = tpu.matmul %1, %4, %cst {dimension_numbers = #tpu.dot_dimension_numbers<[1], [0], [0], [1], [0, 0, 1, 1], [], []>} : vector<104x32xbf16>, vector<32x256xbf16>, vector<104x256xf32> -> vector<104x256xf32>
    %c0_5 = arith.constant 0 : index
    %c0_6 = arith.constant 0 : index
    %6 = vector.load %arg4[%c0_5, %c0_6] : memref<8x256xbf16, #tpu.memory_space<vmem>>, vector<8x256xbf16>
    %cst_7 = arith.constant dense<0.000000e+00> : vector<104x256xf32>
    %7 = tpu.matmul %3, %6, %cst_7 {dimension_numbers = #tpu.dot_dimension_numbers<[1], [0], [0], [1], [0, 0, 1, 1], [], []>} : vector<104x8xbf16>, vector<8x256xbf16>, vector<104x256xf32> -> vector<104x256xf32>
    %8 = arith.addf %5, %7 : vector<104x256xf32>
    %c0_8 = arith.constant 0 : index
    %c0_9 = arith.constant 0 : index
    %9 = vector.load %arg5[%c0_8, %c0_9] : memref<1x256xf32, #tpu.memory_space<vmem>>, vector<1x256xf32>
    %10 = vector.broadcast %9 : vector<1x256xf32> to vector<104x256xf32>
    %11 = arith.addf %8, %10 : vector<104x256xf32>
    %cst_10 = arith.constant 0.000000e+00 : f32
    %12 = vector.broadcast %cst_10 : f32 to vector<104x256xf32>
    %13 = arith.maximumf %11, %12 : vector<104x256xf32>
    %14 = arith.truncf %13 : vector<104x256xf32> to vector<104x256xbf16>
    %c0_11 = arith.constant 0 : index
    %c0_12 = arith.constant 0 : index
    %15 = vector.load %arg6[%c0_11, %c0_12] : memref<256x256xbf16, #tpu.memory_space<vmem>>, vector<256x256xbf16>
    %cst_13 = arith.constant dense<0.000000e+00> : vector<104x256xf32>
    %16 = tpu.matmul %14, %15, %cst_13 {dimension_numbers = #tpu.dot_dimension_numbers<[1], [0], [0], [1], [0, 0, 1, 1], [], []>} : vector<104x256xbf16>, vector<256x256xbf16>, vector<104x256xf32> -> vector<104x256xf32>
    %c0_14 = arith.constant 0 : index
    %c0_15 = arith.constant 0 : index
    %17 = vector.load %arg7[%c0_14, %c0_15] : memref<1x256xf32, #tpu.memory_space<vmem>>, vector<1x256xf32>
    %18 = vector.broadcast %17 : vector<1x256xf32> to vector<104x256xf32>
    %19 = arith.addf %16, %18 : vector<104x256xf32>
    %cst_16 = arith.constant 0.000000e+00 : f32
    %20 = vector.broadcast %cst_16 : f32 to vector<104x256xf32>
    %21 = arith.maximumf %19, %20 : vector<104x256xf32>
    %22 = arith.truncf %21 : vector<104x256xf32> to vector<104x256xbf16>
    %c0_17 = arith.constant 0 : index
    %c0_18 = arith.constant 0 : index
    %23 = vector.load %arg8[%c0_17, %c0_18] : memref<256x32xbf16, #tpu.memory_space<vmem>>, vector<256x32xbf16>
    %cst_19 = arith.constant dense<0.000000e+00> : vector<104x32xf32>
    %24 = tpu.matmul %22, %23, %cst_19 {dimension_numbers = #tpu.dot_dimension_numbers<[1], [0], [0], [1], [0, 0, 1, 1], [], []>} : vector<104x256xbf16>, vector<256x32xbf16>, vector<104x32xf32> -> vector<104x32xf32>
    %c0_20 = arith.constant 0 : index
    %c0_21 = arith.constant 0 : index
    %25 = vector.load %arg9[%c0_20, %c0_21] : memref<1x32xf32, #tpu.memory_space<vmem>>, vector<1x32xf32>
    %26 = vector.broadcast %25 : vector<1x32xf32> to vector<104x32xf32>
    %27 = arith.addf %24, %26 : vector<104x32xf32>
    %c0_22 = arith.constant 0 : index
    %c0_23 = arith.constant 0 : index
    %28 = vector.load %arg10[%c0_22, %c0_23] : memref<104x32xf32, #tpu.memory_space<vmem>>, vector<104x32xf32>
    tpu.vector_store %arg10[%c0_22, %c0_23], %27 {strides = array<i32>} : memref<104x32xf32, #tpu.memory_space<vmem>>, vector<104x32xf32>,
    return
  }
  func.func @transform_0(%arg0: i32) -> (i32, i32) {
    %c0_i32 = arith.constant 0 : i32
    %c0_i32_0 = arith.constant 0 : i32
    return %arg0, %c0_i32 : i32, i32
  }
  func.func @transform_1(%arg0: i32) -> (i32, i32) {
    %c0_i32 = arith.constant 0 : i32
    %c0_i32_0 = arith.constant 0 : i32
    return %arg0, %c0_i32 : i32, i32
  }
  func.func @transform_2(%arg0: i32) -> (i32, i32) {
    %c0_i32 = arith.constant 0 : i32
    %c0_i32_0 = arith.constant 0 : i32
    %c0_i32_1 = arith.constant 0 : i32
    return %c0_i32, %c0_i32_0 : i32, i32
  }
  func.func @transform_3(%arg0: i32) -> (i32, i32) {
    %c0_i32 = arith.constant 0 : i32
    %c0_i32_0 = arith.constant 0 : i32
    %c0_i32_1 = arith.constant 0 : i32
    return %c0_i32, %c0_i32_0 : i32, i32
  }
  func.func @transform_4(%arg0: i32) -> (i32, i32) {
    %c0_i32 = arith.constant 0 : i32
    %c0_i32_0 = arith.constant 0 : i32
    %c0_i32_1 = arith.constant 0 : i32
    return %c0_i32, %c0_i32_0 : i32, i32
  }
  func.func @transform_5(%arg0: i32) -> (i32, i32) {
    %c0_i32 = arith.constant 0 : i32
    %c0_i32_0 = arith.constant 0 : i32
    %c0_i32_1 = arith.constant 0 : i32
    return %c0_i32, %c0_i32_0 : i32, i32
  }
  func.func @transform_6(%arg0: i32) -> (i32, i32) {
    %c0_i32 = arith.constant 0 : i32
    %c0_i32_0 = arith.constant 0 : i32
    %c0_i32_1 = arith.constant 0 : i32
    return %c0_i32, %c0_i32_0 : i32, i32
  }
  func.func @transform_7(%arg0: i32) -> (i32, i32) {
    %c0_i32 = arith.constant 0 : i32
    %c0_i32_0 = arith.constant 0 : i32
    %c0_i32_1 = arith.constant 0 : i32
    return %c0_i32, %c0_i32_0 : i32, i32
  }
  func.func @transform_8(%arg0: i32) -> (i32, i32) {
    %c0_i32 = arith.constant 0 : i32
    %c0_i32_0 = arith.constant 0 : i32
    %c0_i32_1 = arith.constant 0 : i32
    return %c0_i32, %c0_i32_0 : i32, i32
  }
  func.func @transform_9(%arg0: i32) -> (i32, i32) {
    %c0_i32 = arith.constant 0 : i32
    %c0_i32_0 = arith.constant 0 : i32
    return %arg0, %c0_i32 : i32, i32
  }
}

</mosaic_0001>

<bundles_post_ra>
// kernel: tpu_custom_call.1
= control target key start
LH: loop header
LB: loop body
LE: loop exit
PB: predicated region body
PF: predicated region fallthrough
CT: control target
= control target key end

     0   :  { %s2225_s30 = smov 0   ;;  %s2227_s10 = smov 0   ;;  %s2833_s0 = inlined_call_operand.vmem [shape: f32[200,32], index: 0, kind: input, shape index: {}]   ;;  %s2834_s1 = inlined_call_operand.vmem [shape: f32[200,8], index: 1, kind: input, shape index: {}]   ;;  %s2835_s2 = inlined_call_operand.vmem [shape: bf16[32,256], index: 2, kind: input, shape index: {}]   ;;  %s2836_s3 = inlined_call_operand.vmem [shape: bf16[8,256], index: 3, kind: input, shape index: {}]   ;;  %s2837_s4 = inlined_call_operand.vmem [shape: f32[1,256], index: 4, kind: input, shape index: {}]   ;;  %s2838_s5 = inlined_call_operand.vmem [shape: bf16[256,256], index: 5, kind: input, shape index: {}]   ;;  %s2839_s6 = inlined_call_operand.vmem [shape: f32[1,256], index: 6, kind: input, shape index: {}]   ;;  %s2840_s7 = inlined_call_operand.vmem [shape: bf16[256,32], index: 7, kind: input, shape index: {}]   ;;  %s2841_s8 = inlined_call_operand.vmem [shape: f32[1,32], index: 8, kind: input, shape index: {}]   ;;  %s2842_s9 = inlined_call_operand.vmem [shape: f32[200,32], index: 9, kind: output, shape index: {}]  }
   0x1   :  { %s2229_s11 = smov 0  }
   0x2 LB: > { %s2238_s12 = sadd.s32 4294967295, %s2141_s11   ;;  %s2240_s13 = sadd.s32 1, %s2141_s11   ;;  %s2141_s11 = sphi %s2229_s11, %s2851_s11   ;;  %s2137_s10 = sphi %s2227_s10, %s2850_s10   ;;  %s2133_s30 = sphi %s2225_s30, %s2849_s30  }
   0x3   : > { %s222_s14 = ssub.s32 %s2141_s11, %s2240_s13  ;;  %s225_s15 = sadd.s32 1, %s2137_s10 }
   0x4   : > { %p223_p0 = scmp.eq.s32.totalorder %s222_s14, 0  ;;  %p235_p1 = scmp.ne.s32.totalorder %s2137_s10, %s2133_s30 }
   0x5   : > { %p236_p2 = scmp.eq.s32.totalorder %s2238_s12, 1  ;;  %p1684_p3 = scmp.ge.s32.totalorder %s2141_s11, 1 }
   0x6   : > { %s2248_s16 = scalar_select %p223_p0, %s2137_s10, %s225_s15  }
   0x7   : > { %p2250_p4 = por %p236_p2, %p235_p1  ;;  %p315_p5 = scmp.lt.s32.totalorder %s2141_s11, 3 }
   0x9   : > { %p316_p6 = pnand %p1684_p3, %p315_p5 }
   0xa   : > { %s2258_s20 = smul.u32 (!%p316_p6), 13, %s2238_s12  ;;  %s360_s19 = sand.u32 (!%p316_p6), 1, %s2133_s30  }
   0xb   : > { %319 = sbr.rel (%p316_p6) target bundleno = 660 (0x294), region = 56 }
   0xc   : > { %p368_p7 = scmp.lt.s32.totalorder (!%p316_p6), %s2258_s20, 24  ;;  %s1990_s23 = smul.u32 (!%p316_p6), 104, %s360_s19 }
  0x10   : > { %v441_v0 = vld [vmem:[%s2836_s3] sm:$0xff]  ;;  %v1711_v1 = vld [vmem:[%s2835_s2 + $0x10] sm:$0xf]  ;;  %v1938_v4 = vld [vmem:[%s2835_s2 + $0x14] sm:$0xf0]  ;;  %vm469_vm0 = vcmask 1043456  }
  0x11   : > { %v443_v2 = vunpack.c.l.b16 %v441_v0  ;;  %v444_v3 = vunpack.c.h.b16 %v441_v0  ;;  %v1937_v5 = vld [vmem:[%s2835_s2 + $0x14] sm:$0xf]  ;;  %v1713_v6 = vld [vmem:[%s2835_s2 + $0x18] sm:$0xf0]  ;;  %v1712_v9 = vor.u32 %v1938_v4, %v1711_v1  ;;  %s2274_s29 = scalar_select %p368_p7, %s2258_s20, 24  ;;  %vm447_vm1 = vcmask 64512  }
  0x12   : > { %v1716_v10 = vor.u32 %v1937_v5, %v1713_v6  ;;  %v1703_v11 = vld [vmem:[%s2835_s2] sm:$0xf]  ;;  %v1936_v12 = vld [vmem:[%s2835_s2 + $0x4] sm:$0xf0]  ;;  %v1935_v15 = vld [vmem:[%s2835_s2 + $0x4] sm:$0xf] }
  0x13   : > { %v445_v7 = vpack.c.b16 %v443_v2, %v443_v2  ;;  %v446_v8 = vpack.c.b16 %v444_v3, %v444_v3  ;;  %v1705_v16 = vld [vmem:[%s2835_s2 + $0x8] sm:$0xf0]  ;;  %s1685_s24 = sshll.u32 %s2274_s29, 3  ;;  %v1704_v19 = vor.u32 %v1936_v12, %v1703_v11  ;;  %vm582_vm2 = vcmask 261120   ;;  %v1953_v39 = vld [vmem:[%s2838_s5 + $0x74] sm:$0xf] }
  0x14   : > { %s2294_s27 = scalar_lea.vmem %s2834_s1, %s1685_s24  ;;  %v1708_v20 = vor.u32 %v1935_v15, %v1705_v16  ;;  %s2324_s14 = scalar_lea.vmem %s2833_s0, %s1685_s24  ;;  %v1791_v40 = vld [vmem:[%s2838_s5 + $0x78] sm:$0xf0]  ;;  %v1969_v41 = vld [vmem:[%s2838_s5 + $0xf4] sm:$0xf]  ;;  %v1951_v51 = vld [vmem:[%s2838_s5 + $0x64] sm:$0xf] }
  0x15   : > { %v471_v13 = vsel %vm469_vm0, %v445_v7, 0  ;;  %v474_v14 = vsel %vm469_vm0, %v446_v8, 0  ;;  %v425_v17 = vld [vmem:[%s2294_s27 + $0x40] sm:$0xff]  ;;  %v426_v18 = vld [vmem:[%s2294_s27 + $0x48] sm:$0xff]  ;;  %v427_v25 = vld [vmem:[%s2294_s27 + $0x50] sm:$0xff]  ;;  %v1794_v42 = vor.u32 %v1953_v39, %v1791_v40  ;;  %s2700_s24 = scalar_lea.vmem [#allocation2], %s1990_s23  }
  0x16   : > { %1988 = vmatpush.bf16.msra.mxu2 %v471_v13  ;;  %1989 = vmatpush.bf16.msra.mxu3 %v474_v14  ;;  %v434_v21 = vpack.c.bf16 %v426_v18, %v425_v17  ;;  %v417_v22 = vld [vmem:[%s2294_s27] sm:$0xff]  ;;  %v418_v23 = vld [vmem:[%s2294_s27 + $0x8] sm:$0xff]  ;;  %v428_v26 = vld [vmem:[%s2294_s27 + $0x58] sm:$0xff]  ;;  %s1411_s30 = ssub.s32 (%p2250_p4), 25, %s2258_s20 }
  0x17   : > { %483 = vmatpush.bf16.msra.mxu0 %v471_v13  ;;  %526 = vmatpush.bf16.msra.mxu1 %v474_v14  ;;  %v430_v24 = vpack.c.bf16 %v418_v23, %v417_v22  ;;  %v435_v27 = vpack.c.bf16 %v428_v26, %v427_v25  ;;  %v419_v28 = vld [vmem:[%s2294_s27 + $0x10] sm:$0xff]  ;;  %v420_v29 = vld [vmem:[%s2294_s27 + $0x18] sm:$0xff]  ;;  %v429_v31 = vld [vmem:[%s2294_s27 + $0x60] sm:$0xff]  ;;  %p1412_p8 = scmp.lt.s32.totalorder (%p2250_p4), %s1411_s30, 13 }
  0x18   : > { %v431_v30 = vpack.c.bf16 %v420_v29, %v419_v28  ;;  %v436_v32 = vpack.c.bf16 %v429_v31, %v429_v31  ;;  %v421_v33 = vld [vmem:[%s2294_s27 + $0x20] sm:$0xff]  ;;  %v422_v34 = vld [vmem:[%s2294_s27 + $0x28] sm:$0xff]  ;;  %v1855_v43 = vld [vmem:[%s2838_s5 + $0xf8] sm:$0xf0] }
  0x19   : > { %1691 = vmatmul.msk.bf16.vlgmr.msra.gmra.mxu2 %vm447_vm1, %v434_v21  ;;  %1698 = vmatmul.msk.bf16.vlgmr.msra.gmra.mxu3 %vm447_vm1, %v434_v21  ;;  %v432_v35 = vpack.c.bf16 %v422_v34, %v421_v33  ;;  %v397_v36 = vld [vmem:[%s2324_s14] sm:$0xff]  ;;  %v398_v37 = vld [vmem:[%s2324_s14 + $0x8] sm:$0xff]  ;;  %v423_v44 = vld [vmem:[%s2294_s27 + $0x30] sm:$0xff]  ;;  %v1858_v46 = vor.u32 %v1969_v41, %v1855_v43 }
  0x1a   : > { %610 = vmatpush.bf16.msrb.mxu2 %v1712_v9  ;;  %653 = vmatpush.bf16.msrb.mxu3 %v1716_v10  ;;  %v410_v38 = vpack.c.bf16 %v398_v37, %v397_v36  ;;  %v424_v45 = vld [vmem:[%s2294_s27 + $0x38] sm:$0xff]  ;;  %v399_v48 = vld [vmem:[%s2324_s14 + $0x10] sm:$0xff]  ;;  %v1783_v52 = vld [vmem:[%s2838_s5 + $0x68] sm:$0xf0] }
  0x1b   : > { %1687 = vmatmul.msk.bf16.vlgmr.msra.gmra.mxu0 %vm447_vm1, %v430_v24  ;;  %1694 = vmatmul.msk.bf16.vlgmr.msra.gmra.mxu1 %vm447_vm1, %v430_v24  ;;  %v433_v47 = vpack.c.bf16 %v424_v45, %v423_v44  ;;  %v400_v49 = vld [vmem:[%s2324_s14 + $0x18] sm:$0xff]  ;;  %v1967_v53 = vld [vmem:[%s2838_s5 + $0xe4] sm:$0xf]  ;;  %v1786_v54 = vor.u32 %v1951_v51, %v1783_v52  ;;  %v1847_v55 = vld [vmem:[%s2838_s5 + $0xe8] sm:$0xf0] }
  0x1c   : > { %v411_v50 = vpack.c.bf16 %v400_v49, %v399_v48  ;;  %v1850_v56 = vor.u32 %v1967_v53, %v1847_v55  ;;  %v401_v57 = vld [vmem:[%s2324_s14 + $0x20] sm:$0xff]  ;;  %v402_v58 = vld [vmem:[%s2324_s14 + $0x28] sm:$0xff]  ;;  %v1949_v60 = vld [vmem:[%s2838_s5 + $0x54] sm:$0xf] }
  0x1d   : > { %v412_v59 = vpack.c.bf16 %v402_v58, %v401_v57  ;;  %v1775_v61 = vld [vmem:[%s2838_s5 + $0x58] sm:$0xf0]  ;;  %v1965_v62 = vld [vmem:[%s2838_s5 + $0xd4] sm:$0xf]  ;;  %v1947_v1 = vld [vmem:[%s2838_s5 + $0x44] sm:$0xf] }
  0x1e   : > { %611 = vmatpush.bf16.msrb.mxu2 %v1704_v19  ;;  %654 = vmatpush.bf16.msrb.mxu3 %v1708_v20  ;;  %v1778_v63 = vor.u32 %v1949_v60, %v1775_v61  ;;  %v1839_v0 = vld [vmem:[%s2838_s5 + $0xd8] sm:$0xf0]  ;;  %v1767_v2 = vld [vmem:[%s2838_s5 + $0x48] sm:$0xf0]  ;;  %v403_v5 = vld [vmem:[%s2324_s14 + $0x30] sm:$0xff] }
  0x1f   : > { %v1842_v3 = vor.u32 %v1965_v62, %v1839_v0  ;;  %v1770_v4 = vor.u32 %v1947_v1, %v1767_v2  ;;  %v404_v6 = vld [vmem:[%s2324_s14 + $0x38] sm:$0xff]  ;;  %v1963_v8 = vld [vmem:[%s2838_s5 + $0xc4] sm:$0xf]  ;;  %v1831_v9 = vld [vmem:[%s2838_s5 + $0xc8] sm:$0xf0] }
  0x20   : > { %v413_v7 = vpack.c.bf16 %v404_v6, %v403_v5  ;;  %v1834_v10 = vor.u32 %v1963_v8, %v1831_v9  ;;  %v1789_v11 = vld [vmem:[%s2838_s5 + $0x70] sm:$0xf]  ;;  %v1954_v12 = vld [vmem:[%s2838_s5 + $0x74] sm:$0xf0]  ;;  %v405_v14 = vld [vmem:[%s2324_s14 + $0x40] sm:$0xff] }
  0x21   : > { %v1790_v13 = vor.u32 %v1954_v12, %v1789_v11  ;;  %v406_v15 = vld [vmem:[%s2324_s14 + $0x48] sm:$0xff]  ;;  %v1853_v16 = vld [vmem:[%s2838_s5 + $0xf0] sm:$0xf]  ;;  %v1970_v17 = vld [vmem:[%s2838_s5 + $0xf4] sm:$0xf0] }
  0x22   : > { %1046 = vmatpush.bf16.msra.mxu2 %v1794_v42  ;;  %1089 = vmatpush.bf16.msra.mxu3 %v1858_v46  ;;  %v1945_v18 = vld [vmem:[%s2838_s5 + $0x34] sm:$0xf]  ;;  %v414_v19 = vpack.c.bf16 %v406_v15, %v405_v14  ;;  %v1854_v20 = vor.u32 %v1970_v17, %v1853_v16  ;;  %v1759_v21 = vld [vmem:[%s2838_s5 + $0x38] sm:$0xf0]  ;;  %v1781_v26 = vld [vmem:[%s2838_s5 + $0x60] sm:$0xf] }
  0x23   : > { %960 = vmatpush.bf16.msrb.mxu0 %v1790_v13  ;;  %v1961_v22 = vld [vmem:[%s2838_s5 + $0xb4] sm:$0xf]  ;;  %v1823_v23 = vld [vmem:[%s2838_s5 + $0xb8] sm:$0xf0]  ;;  %v1762_v24 = vor.u32 %v1945_v18, %v1759_v21  ;;  %v1845_v29 = vld [vmem:[%s2838_s5 + $0xe0] sm:$0xf] }
  0x24   : > { %v1826_v25 = vor.u32 %v1961_v22, %v1823_v23  ;;  %1003 = vmatpush.bf16.msrb.mxu1 %v1854_v20  ;;  %v1773_v31 = vld [vmem:[%s2838_s5 + $0x50] sm:$0xf]  ;;  %v1950_v33 = vld [vmem:[%s2838_s5 + $0x54] sm:$0xf0]  ;;  %v1943_v34 = vld [vmem:[%s2838_s5 + $0x24] sm:$0xf] }
  0x25   : > { %v1774_v36 = vor.u32 %v1950_v33, %v1773_v31  ;;  %v408_v39 = vld [vmem:[%s2324_s14 + $0x58] sm:$0xff]  ;;  %v1837_v40 = vld [vmem:[%s2838_s5 + $0xd0] sm:$0xf]  ;;  %v1959_v42 = vld [vmem:[%s2838_s5 + $0xa4] sm:$0xf] }
  0x26   : > { %1047 = vmatpush.bf16.msra.mxu2 %v1786_v54  ;;  %1090 = vmatpush.bf16.msra.mxu3 %v1850_v56  ;;  %v1966_v41 = vld [vmem:[%s2838_s5 + $0xd4] sm:$0xf0]  ;;  %v1815_v45 = vld [vmem:[%s2838_s5 + $0xa8] sm:$0xf0]  ;;  %v1765_v46 = vld [vmem:[%s2838_s5 + $0x40] sm:$0xf] }
  0x27   : > { %v1838_v44 = vor.u32 %v1966_v41, %v1837_v40  ;;  %v1818_v48 = vor.u32 %v1959_v42, %v1815_v45  ;;  %v1829_v52 = vld [vmem:[%s2838_s5 + $0xc0] sm:$0xf]  ;;  %v1964_v53 = vld [vmem:[%s2838_s5 + $0xc4] sm:$0xf0]  ;;  %v1941_v54 = vld [vmem:[%s2838_s5 + $0x14] sm:$0xf] }
  0x28   : > { %v1830_v55 = vor.u32 %v1964_v53, %v1829_v52  ;;  %v1743_v56 = vld [vmem:[%s2838_s5 + $0x18] sm:$0xf0]  ;;  %v1757_v57 = vld [vmem:[%s2838_s5 + $0x30] sm:$0xf]  ;;  %v1946_v58 = vld [vmem:[%s2838_s5 + $0x34] sm:$0xf0] }
  0x29   : > { %1692 = vmatmul.msk.bf16.gmra.mxu2 %vm447_vm1, %v435_v27  ;;  %1699 = vmatmul.msk.bf16.gmra.mxu3 %vm447_vm1, %v435_v27  ;;  %v1952_v27 = vld [vmem:[%s2838_s5 + $0x64] sm:$0xf0]  ;;  %v1758_v60 = vor.u32 %v1946_v58, %v1757_v57  ;;  %v1957_v61 = vld [vmem:[%s2838_s5 + $0x94] sm:$0xf]  ;;  %v1807_v62 = vld [vmem:[%s2838_s5 + $0x98] sm:$0xf0] }
  0x2a   : > { %1048 = vmatpush.bf16.msra.mxu2 %v1778_v63  ;;  %1091 = vmatpush.bf16.msra.mxu3 %v1842_v3  ;;  %v1782_v28 = vor.u32 %v1952_v27, %v1781_v26  ;;  %v1810_v63 = vor.u32 %v1957_v61, %v1807_v62  ;;  %v409_v0 = vld [vmem:[%s2324_s14 + $0x60] sm:$0xff]  ;;  %v1821_v3 = vld [vmem:[%s2838_s5 + $0xb0] sm:$0xf]  ;;  %v1944_v8 = vld [vmem:[%s2838_s5 + $0x24] sm:$0xf0] }
  0x2b   : > { %1688 = vmatmul.msk.bf16.gmra.mxu0 %vm447_vm1, %v431_v30  ;;  %1695 = vmatmul.msk.bf16.gmra.mxu1 %vm447_vm1, %v431_v30  ;;  %v1968_v30 = vld [vmem:[%s2838_s5 + $0xe4] sm:$0xf0]  ;;  %v1749_v5 = vld [vmem:[%s2838_s5 + $0x20] sm:$0xf]  ;;  %v416_v6 = vpack.c.bf16 %v409_v0, %v409_v0  ;;  %v1939_v15 = vld [vmem:[%s2838_s5 + $0x4] sm:$0xf] }
  0x2c   : > { %961 = vmatpush.bf16.msrb.mxu0 %v1782_v28  ;;  %v1750_v9 = vor.u32 %v1944_v8, %v1749_v5  ;;  %v1813_v12 = vld [vmem:[%s2838_s5 + $0xa0] sm:$0xf]  ;;  %v1960_v13 = vld [vmem:[%s2838_s5 + $0xa4] sm:$0xf0]  ;;  %v1735_v16 = vld [vmem:[%s2838_s5 + $0x8] sm:$0xf0] }
  0x2d   : > { %v1814_v14 = vor.u32 %v1960_v13, %v1813_v12  ;;  %v1955_v17 = vld [vmem:[%s2838_s5 + $0x84] sm:$0xf]  ;;  %v1738_v18 = vor.u32 %v1939_v15, %v1735_v16  ;;  %v1741_v20 = vld [vmem:[%s2838_s5 + $0x10] sm:$0xf]  ;;  %v1942_v21 = vld [vmem:[%s2838_s5 + $0x14] sm:$0xf0] }
  0x2e   : > { %1049 = vmatpush.bf16.msra.mxu2 %v1770_v4  ;;  %1092 = vmatpush.bf16.msra.mxu3 %v1834_v10  ;;  %v1962_v4 = vld [vmem:[%s2838_s5 + $0xb4] sm:$0xf0]  ;;  %v1742_v23 = vor.u32 %v1942_v21, %v1741_v20  ;;  %v1797_v31 = vld [vmem:[%s2838_s5 + $0x80] sm:$0xf]  ;;  %v1956_v33 = vld [vmem:[%s2838_s5 + $0x84] sm:$0xf0] }
  0x2f   : > { %v690_v45 = vld [vmem:[%s2837_s4] sm:$0x3]  ;;  %v1986_v15 = vld [vmem:[%s2840_s7 + $0x78] sm:$0xff] }
  0x30   : > { %962 = vmatpush.bf16.msrb.mxu0 %v1774_v36 }
  0x32   : > { %1050 = vmatpush.bf16.msra.mxu2 %v1762_v24  ;;  %1093 = vmatpush.bf16.msra.mxu3 %v1826_v25  ;;  %v1805_v24 = vld [vmem:[%s2838_s5 + $0x90] sm:$0xf]  ;;  %v1958_v25 = vld [vmem:[%s2838_s5 + $0x94] sm:$0xf0] }
  0x33   : > { %v1806_v28 = vor.u32 %v1958_v25, %v1805_v24 }
  0x36   : > { %1094 = vmatpush.bf16.msra.mxu3 %v1818_v48 }
  0x39   : > { %1693 = vmatmul.msk.bf16.gmra.mxu2 %vm447_vm1, %v436_v32  ;;  %1700 = vmatmul.msk.bf16.gmra.mxu3 %vm447_vm1, %v436_v32  ;;  %v1846_v32 = vor.u32 %v1968_v30, %v1845_v29  ;;  %v1733_v29 = vld [vmem:[%s2838_s5] sm:$0xf]  ;;  %v1940_v30 = vld [vmem:[%s2838_s5 + $0x4] sm:$0xf0] }
  0x3a   : > { %1095 = vmatpush.bf16.msra.mxu3 %v1810_v63 }
  0x3b   : > { %1689 = vmatmul.msk.bf16.gmra.mxu0 %vm447_vm1, %v432_v35  ;;  %1696 = vmatmul.msk.bf16.gmra.mxu1 %vm447_vm1, %v432_v35  ;;  %v1751_v35 = vld [vmem:[%s2838_s5 + $0x28] sm:$0xf0] }
  0x3c   : > { %v1754_v37 = vor.u32 %v1943_v34, %v1751_v35  ;;  %1004 = vmatpush.bf16.msrb.mxu1 %v1846_v32  ;;  %v1734_v32 = vor.u32 %v1940_v30, %v1733_v29  ;;  %v1798_v34 = vor.u32 %v1956_v33, %v1797_v31 }
  0x3e   : > { %1051 = vmatpush.bf16.msra.mxu2 %v1754_v37 }
  0x40   : > { %1005 = vmatpush.bf16.msrb.mxu1 %v1838_v44 }
  0x44   : > { %1006 = vmatpush.bf16.msrb.mxu1 %v1830_v55 }
  0x49   : > { %1717 = vmatmul.msk.bf16.vlgmr.msrb.gmra.mxu2 %vm582_vm2, %v410_v38  ;;  %1724 = vmatmul.msk.bf16.vlgmr.msrb.gmra.mxu3 %vm582_vm2, %v410_v38  ;;  %v407_v38 = vld [vmem:[%s2324_s14 + $0x50] sm:$0xff]  ;;  %s1987_s14 = smul.u32 (%p2250_p4), 104, %s2238_s12 }
  0x4a   : > { %v415_v43 = vpack.c.bf16 %v408_v39, %v407_v38 }
  0x4b   : > { %1690 = vmatmul.msk.bf16.gmra.mxu0 %vm447_vm1, %v433_v47  ;;  %1697 = vmatmul.msk.bf16.gmra.mxu1 %vm447_vm1, %v433_v47  ;;  %v1948_v47 = vld [vmem:[%s2838_s5 + $0x44] sm:$0xf0]  ;;  %s2747_s27 = scalar_lea.vmem (%p2250_p4), %s2842_s9, %s1987_s14  }
  0x4c   : > { %v1766_v49 = vor.u32 %v1948_v47, %v1765_v46  ;;  %v2572_v47 = vperm.slane %v690_v45, 0 }
  0x4e   : > { %963 = vmatpush.bf16.msrb.mxu0 %v1766_v49  ;;  %v2574_v49 = vperm.slane %v690_v45, 1 }
  0x52   : > { %964 = vmatpush.bf16.msrb.mxu0 %v1758_v60 }
  0x56   : > { %965 = vmatpush.bf16.msrb.mxu0 %v1750_v9 }
  0x59   : > { %1718 = vmatmul.msk.bf16.gmra.mxu2 %vm582_vm2, %v411_v50  ;;  %1725 = vmatmul.msk.bf16.gmra.mxu3 %vm582_vm2, %v411_v50 }
  0x5a   : > { %966 = vmatpush.bf16.msrb.mxu0 %v1742_v23 }
  0x5e   : > { %967 = vmatpush.bf16.msrb.mxu0 %v1734_v32 }
  0x69   : > { %1719 = vmatmul.msk.bf16.gmra.mxu2 %vm582_vm2, %v412_v59  ;;  %1726 = vmatmul.msk.bf16.gmra.mxu3 %vm582_vm2, %v412_v59  ;;  %v1746_v59 = vor.u32 %v1941_v54, %v1743_v56 }
  0x6b   : > { %1052 = vmatpush.bf16.msra.mxu2 %v1746_v59 }
  0x6f   : > { %1053 = vmatpush.bf16.msra.mxu2 %v1738_v18 }
  0x79   : > { %1720 = vmatmul.msk.bf16.gmra.mxu2 %vm582_vm2, %v413_v7  ;;  %1727 = vmatmul.msk.bf16.gmra.mxu3 %vm582_vm2, %v413_v7  ;;  %v1822_v7 = vor.u32 %v1962_v4, %v1821_v3 }
  0x7b   : > { %1007 = vmatpush.bf16.msrb.mxu1 %v1822_v7 }
  0x7f   : > { %1008 = vmatpush.bf16.msrb.mxu1 %v1814_v14  ;;  %v1978_v14 = vld [vmem:[%s2840_s7 + $0x38] sm:$0xff] }
  0x80   : > { %1304 = vmatpush.bf16.msra.mxu0 %v1978_v14 }
  0x83   : > { %1009 = vmatpush.bf16.msrb.mxu1 %v1806_v28 }
  0x87   : > { %1010 = vmatpush.bf16.msrb.mxu1 %v1798_v34 }
  0x89   : > { %1721 = vmatmul.msk.bf16.gmra.mxu2 %vm582_vm2, %v414_v19  ;;  %1728 = vmatmul.msk.bf16.gmra.mxu3 %vm582_vm2, %v414_v19  ;;  %v1799_v19 = vld [vmem:[%s2838_s5 + $0x88] sm:$0xf0] }
  0x8a   : > { %v1802_v22 = vor.u32 %v1955_v17, %v1799_v19 }
  0x8b   : > { %1347 = vmatpush.bf16.msra.mxu1 %v1986_v15 }
  0x8c   : > { %1096 = vmatpush.bf16.msra.mxu3 %v1802_v22 }
  0x98   : > { %v485_v37 = vpop.f32.mrf.mxu0  ;;  %v528_v38 = vpop.f32.mrf.mxu1 }
  0x99   : > { %1722 = vmatmul.msk.bf16.gmra.mxu2 %vm582_vm2, %v415_v43  ;;  %1729 = vmatmul.msk.bf16.gmra.mxu3 %vm582_vm2, %v415_v43 }
  0x9c   : > { %v2468_v50 = vpop.f32.mrf.mxu2  ;;  %v2470_v51 = vpop.f32.mrf.mxu3 }
  0xa0   : > { %v487_v41 = vpop.f32.mrf.mxu0  ;;  %v530_v42 = vpop.f32.mrf.mxu1 }
  0xa4   : > { %v2497_v1 = vpop.f32.mrf.mxu2  ;;  %v2499_v2 = vpop.f32.mrf.mxu3 }
  0xa8   : > { %v490_v52 = vpop.f32.mrf.mxu0  ;;  %v533_v53 = vpop.f32.mrf.mxu1 }
  0xa9   : > { %1723 = vmatmul.msk.bf16.gmra.mxu2 %vm582_vm2, %v416_v6  ;;  %1730 = vmatmul.msk.bf16.gmra.mxu3 %vm582_vm2, %v416_v6 }
  0xac   : > { %v2515_v10 = vpop.f32.mrf.mxu2  ;;  %v2517_v11 = vpop.f32.mrf.mxu3 }
  0xb0   : > { %v492_v4 = vpop.f32.mrf.mxu0  ;;  %v535_v7 = vpop.f32.mrf.mxu1 }
  0xb4   : > { %v2549_v26 = vpop.f32.mrf.mxu2  ;;  %v2551_v27 = vpop.f32.mrf.mxu3 }
  0xb8   : > { %v495_v20 = vpop.f32.mrf.mxu0  ;;  %v538_v23 = vpop.f32.mrf.mxu1 }
  0xbc   : > { %v2565_v35 = vpop.f32.mrf.mxu2  ;;  %v2567_v36 = vpop.f32.mrf.mxu3 }
  0xc4   : > { %v517_v39 = vpop.f32.mrf.mxu2  ;;  %v560_v40 = vpop.f32.mrf.mxu3 }
  0xc5   : > { %v540_v39 = vpop.f32.mrf.mxu1 }
  0xcc   : > { %v613_v43 = vpop.f32.mrf.mxu2  ;;  %v656_v44 = vpop.f32.mrf.mxu3 }
  0xcd   : > { %v614_v46 = vadd.f32 %v613_v43, %v485_v37  ;;  %v657_v48 = vadd.f32 %v656_v44, %v528_v38  ;;  %v497_v38 = vpop.f32.mrf.mxu0  ;;  %v1985_v43 = vld [vmem:[%s2840_s7 + $0x70] sm:$0xff] }
  0xce   : > { %1348 = vmatpush.bf16.msra.mxu1 %v1985_v43 }
  0xcf   : > { %v696_v56 = vadd.f32 %v2572_v47, %v614_v46  ;;  %v697_v57 = vadd.f32 %v2574_v49, %v657_v48 }
  0xd1   : > { %v722_v62 = vmax.f32 %v696_v56, 0.0  ;;  %v723_v63 = vmax.f32 %v697_v57, 0.0 }
  0xd4   : > { %v615_v54 = vpop.f32.mrf.mxu2  ;;  %v658_v55 = vpop.f32.mrf.mxu3 }
  0xd5   : > { %v616_v58 = vadd.f32 %v615_v54, %v487_v41  ;;  %v659_v59 = vadd.f32 %v658_v55, %v530_v42  ;;  %v1977_v42 = vld [vmem:[%s2840_s7 + $0x30] sm:$0xff] }
  0xd6   : > { %1305 = vmatpush.bf16.msra.mxu0 %v1977_v42 }
  0xd7   : > { %v698_v60 = vadd.f32 %v2572_v47, %v616_v58  ;;  %v699_v61 = vadd.f32 %v2574_v49, %v659_v59  ;;  %v500_v58 = vpop.f32.mrf.mxu0 }
  0xd9   : > { %v724_v0 = vmax.f32 %v698_v60, 0.0  ;;  %v725_v3 = vmax.f32 %v699_v61, 0.0  ;;  %v543_v61 = vpop.f32.mrf.mxu1 }
  0xdb   : > { %v748_v5 = vpack.c.bf16 %v724_v0, %v722_v62  ;;  %v749_v6 = vpack.c.bf16 %v725_v3, %v723_v63 }
  0xdc   : > { %v618_v8 = vpop.f32.mrf.mxu2  ;;  %v661_v9 = vpop.f32.mrf.mxu3 }
  0xdd   : > { %968 = vmatmul.bf16.vlgmr.msrb.gmra.mxu0 %v748_v5  ;;  %1011 = vmatmul.bf16.vlgmr.msrb.gmra.mxu1 %v749_v6  ;;  %v619_v12 = vadd.f32 %v618_v8, %v490_v52  ;;  %v662_v13 = vadd.f32 %v661_v9, %v533_v53 }
  0xde   : > { %1054 = vmatmul.bf16.vlgmr.msra.gmra.mxu2 %v748_v5  ;;  %1097 = vmatmul.bf16.vlgmr.msra.gmra.mxu3 %v749_v6  ;;  %v1976_v6 = vld [vmem:[%s2840_s7 + $0x28] sm:$0xff] }
  0xdf   : > { %v700_v18 = vadd.f32 %v2572_v47, %v619_v12  ;;  %v701_v19 = vadd.f32 %v2574_v49, %v662_v13  ;;  %v502_v8 = vpop.f32.mrf.mxu0  ;;  %1306 = vmatpush.bf16.msra.mxu0 %v1976_v6 }
  0xe1   : > { %v726_v28 = vmax.f32 %v700_v18, 0.0  ;;  %v727_v29 = vmax.f32 %v701_v19, 0.0  ;;  %v545_v9 = vpop.f32.mrf.mxu1 }
  0xe4   : > { %v620_v16 = vpop.f32.mrf.mxu2  ;;  %v663_v17 = vpop.f32.mrf.mxu3 }
  0xe5   : > { %v621_v21 = vadd.f32 %v620_v16, %v492_v4  ;;  %v664_v22 = vadd.f32 %v663_v17, %v535_v7  ;;  %v1984_v7 = vld [vmem:[%s2840_s7 + $0x68] sm:$0xff] }
  0xe6   : > { %1349 = vmatpush.bf16.msra.mxu1 %v1984_v7 }
  0xe7   : > { %v702_v24 = vadd.f32 %v2572_v47, %v621_v21  ;;  %v703_v25 = vadd.f32 %v2574_v49, %v664_v22 }
  0xe9   : > { %v728_v30 = vmax.f32 %v702_v24, 0.0  ;;  %v729_v31 = vmax.f32 %v703_v25, 0.0  ;;  %v1975_v24 = vld [vmem:[%s2840_s7 + $0x20] sm:$0xff] }
  0xea   : > { %v1983_v25 = vld [vmem:[%s2840_s7 + $0x60] sm:$0xff]  ;;  %1307 = vmatpush.bf16.msra.mxu0 %v1975_v24 }
  0xeb   : > { %v750_v32 = vpack.c.bf16 %v728_v30, %v726_v28  ;;  %v751_v33 = vpack.c.bf16 %v729_v31, %v727_v29  ;;  %1350 = vmatpush.bf16.msra.mxu1 %v1983_v25 }
  0xec   : > { %v623_v34 = vpop.f32.mrf.mxu2  ;;  %v666_v37 = vpop.f32.mrf.mxu3 }
  0xed   : > { %973 = vmatmul.bf16.gmra.mxu0 %v750_v32  ;;  %1016 = vmatmul.bf16.gmra.mxu1 %v751_v33  ;;  %v624_v40 = vadd.f32 %v623_v34, %v495_v20  ;;  %v667_v41 = vadd.f32 %v666_v37, %v538_v23 }
  0xee   : > { %1059 = vmatmul.bf16.gmra.mxu2 %v750_v32  ;;  %1102 = vmatmul.bf16.gmra.mxu3 %v751_v33  ;;  %v1974_v32 = vld [vmem:[%s2840_s7 + $0x18] sm:$0xff] }
  0xef   : > { %v704_v46 = vadd.f32 %v2572_v47, %v624_v40  ;;  %v705_v48 = vadd.f32 %v2574_v49, %v667_v41  ;;  %v1982_v33 = vld [vmem:[%s2840_s7 + $0x58] sm:$0xff]  ;;  %1308 = vmatpush.bf16.msra.mxu0 %v1974_v32 }
  0xf0   : > { %1351 = vmatpush.bf16.msra.mxu1 %v1982_v33 }
  0xf1   : > { %v730_v56 = vmax.f32 %v704_v46, 0.0  ;;  %v731_v57 = vmax.f32 %v705_v48, 0.0 }
  0xf4   : > { %v625_v44 = vpop.f32.mrf.mxu2  ;;  %v668_v45 = vpop.f32.mrf.mxu3 }
  0xf5   : > { %v626_v52 = vadd.f32 %v625_v44, %v497_v38  ;;  %v669_v53 = vadd.f32 %v668_v45, %v540_v39 }
  0xf7   : > { %v706_v54 = vadd.f32 %v2572_v47, %v626_v52  ;;  %v707_v55 = vadd.f32 %v2574_v49, %v669_v53 }
  0xf9   : > { %v732_v59 = vmax.f32 %v706_v54, 0.0  ;;  %v733_v60 = vmax.f32 %v707_v55, 0.0 }
  0xfb   : > { %v752_v62 = vpack.c.bf16 %v732_v59, %v730_v56  ;;  %v753_v63 = vpack.c.bf16 %v733_v60, %v731_v57  ;;  %v1972_v56 = vld [vmem:[%s2840_s7 + $0x8] sm:$0xff] }
  0xfc   : > { %v628_v0 = vpop.f32.mrf.mxu2  ;;  %v671_v3 = vpop.f32.mrf.mxu3  ;;  %v1980_v57 = vld [vmem:[%s2840_s7 + $0x48] sm:$0xff] }
  0xfd   : > { %978 = vmatmul.bf16.gmra.mxu0 %v752_v62  ;;  %1021 = vmatmul.bf16.gmra.mxu1 %v753_v63  ;;  %v629_v4 = vadd.f32 %v628_v0, %v500_v58  ;;  %v672_v5 = vadd.f32 %v671_v3, %v543_v61 }
  0xfe   : > { %1064 = vmatmul.bf16.gmra.mxu2 %v752_v62  ;;  %1107 = vmatmul.bf16.gmra.mxu3 %v753_v63 }
  0xff   : > { %v708_v14 = vadd.f32 %v2572_v47, %v629_v4  ;;  %v709_v15 = vadd.f32 %v2574_v49, %v672_v5 }
 0x101   : > { %v734_v20 = vmax.f32 %v708_v14, 0.0  ;;  %v735_v21 = vmax.f32 %v709_v15, 0.0 }
 0x104   : > { %v630_v12 = vpop.f32.mrf.mxu2  ;;  %v673_v13 = vpop.f32.mrf.mxu3 }
 0x105   : > { %v631_v16 = vadd.f32 %v630_v12, %v502_v8  ;;  %v674_v17 = vadd.f32 %v673_v13, %v545_v9 }
 0x107   : > { %v710_v18 = vadd.f32 %v2572_v47, %v631_v16  ;;  %v711_v19 = vadd.f32 %v2574_v49, %v674_v17 }
 0x109   : > { %v736_v22 = vmax.f32 %v710_v18, 0.0  ;;  %v737_v23 = vmax.f32 %v711_v19, 0.0 }
 0x10b   : > { %v754_v28 = vpack.c.bf16 %v736_v22, %v734_v20  ;;  %v755_v29 = vpack.c.bf16 %v737_v23, %v735_v21 }
 0x10c   : > { %v633_v30 = vpop.f32.mrf.mxu2  ;;  %v676_v31 = vpop.f32.mrf.mxu3 }
 0x10d   : > { %983 = vmatmul.bf16.gmra.mxu0 %v754_v28  ;;  %1026 = vmatmul.bf16.gmra.mxu1 %v755_v29  ;;  %v634_v34 = vadd.f32 %v633_v30, %v2468_v50  ;;  %v677_v37 = vadd.f32 %v676_v31, %v2470_v51 }
 0x10e   : > { %1069 = vmatmul.bf16.gmra.mxu2 %v754_v28  ;;  %1112 = vmatmul.bf16.gmra.mxu3 %v755_v29 }
 0x10f   : > { %v712_v40 = vadd.f32 %v2572_v47, %v634_v34  ;;  %v713_v41 = vadd.f32 %v2574_v49, %v677_v37 }
 0x111   : > { %v738_v46 = vmax.f32 %v712_v40, 0.0  ;;  %v739_v48 = vmax.f32 %v713_v41, 0.0 }
 0x114   : > { %v635_v38 = vpop.f32.mrf.mxu2  ;;  %v678_v39 = vpop.f32.mrf.mxu3 }
 0x115   : > { %v636_v42 = vadd.f32 %v635_v38, %v2497_v1  ;;  %v679_v43 = vadd.f32 %v678_v39, %v2499_v2  ;;  %v1973_v1 = vld [vmem:[%s2840_s7 + $0x10] sm:$0xff] }
 0x116   : > { %v1981_v2 = vld [vmem:[%s2840_s7 + $0x50] sm:$0xff]  ;;  %1309 = vmatpush.bf16.msra.mxu0 %v1973_v1 }
 0x117   : > { %v714_v44 = vadd.f32 %v2572_v47, %v636_v42  ;;  %v715_v45 = vadd.f32 %v2574_v49, %v679_v43  ;;  %1352 = vmatpush.bf16.msra.mxu1 %v1981_v2 }
 0x119   : > { %v740_v52 = vmax.f32 %v714_v44, 0.0  ;;  %v741_v50 = vmax.f32 %v715_v45, 0.0 }
 0x11a   : > { %1310 = vmatpush.bf16.msra.mxu0 %v1972_v56 }
 0x11b   : > { %v756_v53 = vpack.c.bf16 %v740_v52, %v738_v46  ;;  %v757_v51 = vpack.c.bf16 %v741_v50, %v739_v48  ;;  %1353 = vmatpush.bf16.msra.mxu1 %v1980_v57 }
 0x11c   : > { %v638_v54 = vpop.f32.mrf.mxu2  ;;  %v681_v55 = vpop.f32.mrf.mxu3 }
 0x11d   : > { %988 = vmatmul.bf16.gmra.mxu0 %v756_v53  ;;  %1031 = vmatmul.bf16.gmra.mxu1 %v757_v51  ;;  %v639_v58 = vadd.f32 %v638_v54, %v2515_v10  ;;  %v682_v59 = vadd.f32 %v681_v55, %v2517_v11 }
 0x11e   : > { %1074 = vmatmul.bf16.gmra.mxu2 %v756_v53  ;;  %1117 = vmatmul.bf16.gmra.mxu3 %v757_v51 }
 0x11f   : > { %v716_v62 = vadd.f32 %v2572_v47, %v639_v58  ;;  %v717_v63 = vadd.f32 %v2574_v49, %v682_v59 }
 0x121   : > { %v742_v6 = vmax.f32 %v716_v62, 0.0  ;;  %v743_v10 = vmax.f32 %v717_v63, 0.0 }
 0x124   : > { %v640_v60 = vpop.f32.mrf.mxu2  ;;  %v683_v61 = vpop.f32.mrf.mxu3 }
 0x125   : > { %v641_v0 = vadd.f32 %v640_v60, %v2549_v26  ;;  %v684_v3 = vadd.f32 %v683_v61, %v2551_v27 }
 0x127   : > { %v718_v4 = vadd.f32 %v2572_v47, %v641_v0  ;;  %v719_v5 = vadd.f32 %v2574_v49, %v684_v3 }
 0x129   : > { %v744_v7 = vmax.f32 %v718_v4, 0.0  ;;  %v745_v11 = vmax.f32 %v719_v5, 0.0 }
 0x12b   : > { %v758_v8 = vpack.c.bf16 %v744_v7, %v742_v6  ;;  %v759_v9 = vpack.c.bf16 %v745_v11, %v743_v10 }
 0x12c   : > { %v643_v12 = vpop.f32.mrf.mxu2  ;;  %v686_v13 = vpop.f32.mrf.mxu3 }
 0x12d   : > { %993 = vmatmul.bf16.gmra.mxu0 %v758_v8  ;;  %1036 = vmatmul.bf16.gmra.mxu1 %v759_v9  ;;  %v644_v26 = vadd.f32 %v643_v12, %v2565_v35  ;;  %v687_v27 = vadd.f32 %v686_v13, %v2567_v36  ;;  %v1971_v35 = vld [vmem:[%s2840_s7] sm:$0xff] }
 0x12e   : > { %1079 = vmatmul.bf16.gmra.mxu2 %v758_v8  ;;  %1122 = vmatmul.bf16.gmra.mxu3 %v759_v9  ;;  %v1979_v36 = vld [vmem:[%s2840_s7 + $0x40] sm:$0xff] }
 0x12f   : > { %v720_v14 = vadd.f32 %v2572_v47, %v644_v26  ;;  %v721_v15 = vadd.f32 %v2574_v49, %v687_v27  ;;  %1311 = vmatpush.bf16.msra.mxu0 %v1971_v35  ;;  %1354 = vmatpush.bf16.msra.mxu1 %v1979_v36  ;;  %v794_v47 = vld [vmem:[%s2839_s6] sm:$0x3] }
 0x130   : > { %v2663_v23 = vperm.slane %v794_v47, 0  ;;  %v2666_v29 = vperm.slane %v794_v47, 1 }
 0x131   : > { %v746_v18 = vmax.f32 %v720_v14, 0.0  ;;  %v747_v19 = vmax.f32 %v721_v15, 0.0 }
 0x133   : > { %v760_v20 = vpack.c.bf16 %v746_v18, %v746_v18  ;;  %v761_v21 = vpack.c.bf16 %v747_v19, %v747_v19 }
 0x134   : > { %v645_v16 = vpop.f32.mrf.mxu2  ;;  %v688_v17 = vpop.f32.mrf.mxu3 }
 0x13d   : > { %998 = vmatmul.bf16.gmra.mxu0 %v760_v20  ;;  %1041 = vmatmul.bf16.gmra.mxu1 %v761_v21 }
 0x13e   : > { %1084 = vmatmul.bf16.gmra.mxu2 %v760_v20  ;;  %1127 = vmatmul.bf16.gmra.mxu3 %v761_v21 }
 0x15a   : > { %v969_v49 = vpop.f32.mrf.mxu0  ;;  %v1012_v22 = vpop.f32.mrf.mxu1 }
 0x15b   : > { %v970_v24 = vadd.f32 %v969_v49, %v2663_v23 }
 0x15d   : > { %v1013_v32 = vadd.f32 %v1012_v22, %v970_v24 }
 0x15f   : > { %v1132_v38 = vmax.f32 %v1013_v32, 0.0 }
 0x161   : > { %v1055_v25 = vpop.f32.mrf.mxu2  ;;  %v1098_v28 = vpop.f32.mrf.mxu3 }
 0x162   : > { %v971_v30 = vpop.f32.mrf.mxu0  ;;  %v1014_v31 = vpop.f32.mrf.mxu1  ;;  %v1056_v37 = vadd.f32 %v1055_v25, %v2666_v29 }
 0x163   : > { %v972_v33 = vadd.f32 %v971_v30, %v2663_v23 }
 0x164   : > { %v1099_v43 = vadd.f32 %v1098_v28, %v1056_v37 }
 0x165   : > { %v1015_v34 = vadd.f32 %v1014_v31, %v972_v33 }
 0x166   : > { %v1133_v52 = vmax.f32 %v1099_v43, 0.0 }
 0x167   : > { %v1134_v39 = vmax.f32 %v1015_v34, 0.0 }
 0x169   : > { %v1158_v40 = vpack.c.bf16 %v1134_v39, %v1132_v38  ;;  %v1057_v41 = vpop.f32.mrf.mxu2  ;;  %v1100_v42 = vpop.f32.mrf.mxu3 }
 0x16a   : > { %v1058_v44 = vadd.f32 %v1057_v41, %v2666_v29  ;;  %v974_v45 = vpop.f32.mrf.mxu0  ;;  %v1017_v46 = vpop.f32.mrf.mxu1 }
 0x16b   : > { %1312 = vmatmul.bf16.vlgmr.msra.gmra.mxu0 %v1158_v40  ;;  %v975_v53 = vadd.f32 %v974_v45, %v2663_v23 }
 0x16c   : > { %v1101_v48 = vadd.f32 %v1100_v42, %v1058_v44 }
 0x16d   : > { %v1018_v56 = vadd.f32 %v1017_v46, %v975_v53 }
 0x16e   : > { %v1135_v50 = vmax.f32 %v1101_v48, 0.0 }
 0x16f   : > { %v1136_v60 = vmax.f32 %v1018_v56, 0.0 }
 0x170   : > { %v1159_v51 = vpack.c.bf16 %v1135_v50, %v1133_v52 }
 0x171   : > { %v1060_v54 = vpop.f32.mrf.mxu2  ;;  %v1103_v55 = vpop.f32.mrf.mxu3 }
 0x172   : > { %1355 = vmatmul.bf16.vlgmr.msra.gmra.mxu1 %v1159_v51  ;;  %v976_v1 = vpop.f32.mrf.mxu0  ;;  %v1019_v2 = vpop.f32.mrf.mxu1  ;;  %v1061_v59 = vadd.f32 %v1060_v54, %v2666_v29 }
 0x173   : > { %v977_v57 = vadd.f32 %v976_v1, %v2663_v23 }
 0x174   : > { %v1104_v3 = vadd.f32 %v1103_v55, %v1061_v59 }
 0x175   : > { %v1020_v58 = vadd.f32 %v1019_v2, %v977_v57 }
 0x176   : > { %v1137_v7 = vmax.f32 %v1104_v3, 0.0 }
 0x177   : > { %v1138_v61 = vmax.f32 %v1020_v58, 0.0 }
 0x179   : > { %v1062_v62 = vpop.f32.mrf.mxu2  ;;  %v1105_v63 = vpop.f32.mrf.mxu3  ;;  %v1160_v0 = vpack.c.bf16 %v1138_v61, %v1136_v60 }
 0x17a   : > { %v1063_v4 = vadd.f32 %v1062_v62, %v2666_v29  ;;  %v979_v5 = vpop.f32.mrf.mxu0  ;;  %v1022_v6 = vpop.f32.mrf.mxu1 }
 0x17b   : > { %1317 = vmatmul.bf16.gmra.mxu0 %v1160_v0  ;;  %v980_v8 = vadd.f32 %v979_v5, %v2663_v23 }
 0x17c   : > { %v1106_v10 = vadd.f32 %v1105_v63, %v1063_v4 }
 0x17d   : > { %v1023_v14 = vadd.f32 %v1022_v6, %v980_v8 }
 0x17e   : > { %v1139_v11 = vmax.f32 %v1106_v10, 0.0 }
 0x17f   : > { %v1140_v18 = vmax.f32 %v1023_v14, 0.0 }
 0x180   : > { %v1161_v9 = vpack.c.bf16 %v1139_v11, %v1137_v7 }
 0x181   : > { %v1065_v12 = vpop.f32.mrf.mxu2  ;;  %v1108_v13 = vpop.f32.mrf.mxu3 }
 0x182   : > { %1360 = vmatmul.bf16.gmra.mxu1 %v1161_v9  ;;  %v981_v26 = vpop.f32.mrf.mxu0  ;;  %v1024_v27 = vpop.f32.mrf.mxu1  ;;  %v1066_v17 = vadd.f32 %v1065_v12, %v2666_v29 }
 0x183   : > { %v982_v15 = vadd.f32 %v981_v26, %v2663_v23 }
 0x184   : > { %v1109_v36 = vadd.f32 %v1108_v13, %v1066_v17 }
 0x185   : > { %v1025_v16 = vadd.f32 %v1024_v27, %v982_v15 }
 0x186   : > { %v1141_v25 = vmax.f32 %v1109_v36, 0.0 }
 0x187   : > { %v1142_v19 = vmax.f32 %v1025_v16, 0.0 }
 0x189   : > { %v1162_v20 = vpack.c.bf16 %v1142_v19, %v1140_v18  ;;  %v1067_v21 = vpop.f32.mrf.mxu2  ;;  %v1110_v35 = vpop.f32.mrf.mxu3 }
 0x18a   : > { %v1068_v47 = vadd.f32 %v1067_v21, %v2666_v29  ;;  %v984_v49 = vpop.f32.mrf.mxu0  ;;  %v1027_v22 = vpop.f32.mrf.mxu1 }
 0x18b   : > { %1322 = vmatmul.bf16.gmra.mxu0 %v1162_v20  ;;  %v985_v30 = vadd.f32 %v984_v49, %v2663_v23 }
 0x18c   : > { %v1111_v24 = vadd.f32 %v1110_v35, %v1068_v47 }
 0x18d   : > { %v1028_v38 = vadd.f32 %v1027_v22, %v985_v30 }
 0x18e   : > { %v1143_v28 = vmax.f32 %v1111_v24, 0.0 }
 0x18f   : > { %v1144_v42 = vmax.f32 %v1028_v38, 0.0 }
 0x190   : > { %v1163_v31 = vpack.c.bf16 %v1143_v28, %v1141_v25 }
 0x191   : > { %v1070_v32 = vpop.f32.mrf.mxu2  ;;  %v1113_v33 = vpop.f32.mrf.mxu3 }
 0x192   : > { %1365 = vmatmul.bf16.gmra.mxu1 %v1163_v31  ;;  %v986_v34 = vpop.f32.mrf.mxu0  ;;  %v1029_v37 = vpop.f32.mrf.mxu1  ;;  %v1071_v41 = vadd.f32 %v1070_v32, %v2666_v29 }
 0x193   : > { %v987_v39 = vadd.f32 %v986_v34, %v2663_v23 }
 0x194   : > { %v1114_v48 = vadd.f32 %v1113_v33, %v1071_v41 }
 0x195   : > { %v1030_v40 = vadd.f32 %v1029_v37, %v987_v39 }
 0x196   : > { %v1145_v54 = vmax.f32 %v1114_v48, 0.0 }
 0x197   : > { %v1146_v43 = vmax.f32 %v1030_v40, 0.0 }
 0x199   : > { %v1164_v44 = vpack.c.bf16 %v1146_v43, %v1144_v42  ;;  %v1072_v45 = vpop.f32.mrf.mxu2  ;;  %v1115_v46 = vpop.f32.mrf.mxu3 }
 0x19a   : > { %v1073_v52 = vadd.f32 %v1072_v45, %v2666_v29  ;;  %v989_v50 = vpop.f32.mrf.mxu0  ;;  %v1032_v53 = vpop.f32.mrf.mxu1 }
 0x19b   : > { %1327 = vmatmul.bf16.gmra.mxu0 %v1164_v44  ;;  %v990_v1 = vadd.f32 %v989_v50, %v2663_v23 }
 0x19c   : > { %v1116_v51 = vadd.f32 %v1115_v46, %v1073_v52 }
 0x19d   : > { %v1033_v60 = vadd.f32 %v1032_v53, %v990_v1 }
 0x19e   : > { %v1147_v55 = vmax.f32 %v1116_v51, 0.0  ;;  %v2697_v51 = vld [vmem:[%s2841_s8] ss:$0 sm:$0xff] }
 0x19f   : > { %v1148_v0 = vmax.f32 %v1033_v60, 0.0 }
 0x1a0   : > { %v1165_v2 = vpack.c.bf16 %v1147_v55, %v1145_v54 }
 0x1a1   : > { %v1075_v56 = vpop.f32.mrf.mxu2  ;;  %v1118_v57 = vpop.f32.mrf.mxu3 }
 0x1a2   : > { %1370 = vmatmul.bf16.gmra.mxu1 %v1165_v2  ;;  %v991_v58 = vpop.f32.mrf.mxu0  ;;  %v1034_v59 = vpop.f32.mrf.mxu1  ;;  %v1076_v63 = vadd.f32 %v1075_v56, %v2666_v29 }
 0x1a3   : > { %v992_v61 = vadd.f32 %v991_v58, %v2663_v23 }
 0x1a4   : > { %v1119_v10 = vadd.f32 %v1118_v57, %v1076_v63 }
 0x1a5   : > { %v1035_v62 = vadd.f32 %v1034_v59, %v992_v61 }
 0x1a6   : > { %v1149_v12 = vmax.f32 %v1119_v10, 0.0 }
 0x1a7   : > { %v1150_v3 = vmax.f32 %v1035_v62, 0.0 }
 0x1a9   : > { %v1166_v4 = vpack.c.bf16 %v1150_v3, %v1148_v0  ;;  %v1077_v5 = vpop.f32.mrf.mxu2  ;;  %v1120_v6 = vpop.f32.mrf.mxu3 }
 0x1aa   : > { %v1078_v7 = vadd.f32 %v1077_v5, %v2666_v29  ;;  %v994_v11 = vpop.f32.mrf.mxu0  ;;  %v1037_v8 = vpop.f32.mrf.mxu1 }
 0x1ab   : > { %1332 = vmatmul.bf16.gmra.mxu0 %v1166_v4  ;;  %v995_v26 = vadd.f32 %v994_v11, %v2663_v23 }
 0x1ac   : > { %v1121_v9 = vadd.f32 %v1120_v6, %v1078_v7 }
 0x1ad   : > { %v1038_v18 = vadd.f32 %v1037_v8, %v995_v26 }
 0x1ae   : > { %v1151_v13 = vmax.f32 %v1121_v9, 0.0 }
 0x1af   : > { %v1152_v35 = vmax.f32 %v1038_v18, 0.0 }
 0x1b0   : > { %v1167_v27 = vpack.c.bf16 %v1151_v13, %v1149_v12 }
 0x1b1   : > { %v1080_v14 = vpop.f32.mrf.mxu2  ;;  %v1123_v15 = vpop.f32.mrf.mxu3 }
 0x1b2   : > { %1375 = vmatmul.bf16.gmra.mxu1 %v1167_v27  ;;  %v996_v16 = vpop.f32.mrf.mxu0  ;;  %v1039_v17 = vpop.f32.mrf.mxu1  ;;  %v1081_v21 = vadd.f32 %v1080_v14, %v2666_v29 }
 0x1b3   : > { %v997_v19 = vadd.f32 %v996_v16, %v2663_v23 }
 0x1b4   : > { %v1124_v24 = vadd.f32 %v1123_v15, %v1081_v21 }
 0x1b5   : > { %v1040_v20 = vadd.f32 %v1039_v17, %v997_v19 }
 0x1b6   : > { %v1153_v33 = vmax.f32 %v1124_v24, 0.0 }
 0x1b7   : > { %v1154_v36 = vmax.f32 %v1040_v20, 0.0 }
 0x1b9   : > { %v1168_v47 = vpack.c.bf16 %v1154_v36, %v1152_v35  ;;  %v1082_v49 = vpop.f32.mrf.mxu2  ;;  %v1125_v22 = vpop.f32.mrf.mxu3 }
 0x1ba   : > { %v1083_v25 = vadd.f32 %v1082_v49, %v2666_v29  ;;  %v999_v28 = vpop.f32.mrf.mxu0  ;;  %v1042_v30 = vpop.f32.mrf.mxu1 }
 0x1bb   : > { %1337 = vmatmul.bf16.gmra.mxu0 %v1168_v47  ;;  %v1000_v32 = vadd.f32 %v999_v28, %v2663_v23 }
 0x1bc   : > { %v1126_v31 = vadd.f32 %v1125_v22, %v1083_v25 }
 0x1bd   : > { %v1043_v38 = vadd.f32 %v1042_v30, %v1000_v32 }
 0x1be   : > { %v1155_v34 = vmax.f32 %v1126_v31, 0.0 }
 0x1bf   : > { %v1156_v44 = vmax.f32 %v1043_v38, 0.0 }
 0x1c0   : > { %v1169_v37 = vpack.c.bf16 %v1155_v34, %v1153_v33 }
 0x1c1   : > { %v1085_v39 = vpop.f32.mrf.mxu2  ;;  %v1128_v40 = vpop.f32.mrf.mxu3  ;;  %v1170_v46 = vpack.c.bf16 %v1156_v44, %v1156_v44 }
 0x1c2   : > { %1380 = vmatmul.bf16.gmra.mxu1 %v1169_v37  ;;  %v1001_v41 = vpop.f32.mrf.mxu0  ;;  %v1044_v42 = vpop.f32.mrf.mxu1  ;;  %v1086_v43 = vadd.f32 %v1085_v39, %v2666_v29 }
 0x1c4   : > { %v1129_v45 = vadd.f32 %v1128_v40, %v1086_v43 }
 0x1c6   : > { %v1157_v50 = vmax.f32 %v1129_v45, 0.0 }
 0x1c8   : > { %v1171_v23 = vpack.c.bf16 %v1157_v50, %v1157_v50 }
 0x1c9   : > { %v1087_v48 = vpop.f32.mrf.mxu2  ;;  %v1130_v52 = vpop.f32.mrf.mxu3 }
 0x1cb   : > { %1342 = vmatmul.bf16.gmra.mxu0 %v1170_v46 }
 0x1d2   : > { %1385 = vmatmul.bf16.gmra.mxu1 %v1171_v23 }
 0x1e8   : > { %v1313_v53 = vpop.f32.mrf.mxu0 }
 0x1e9   : > { %v1314_v54 = vadd.f32 %v2697_v51, %v1313_v53 }
 0x1ef   : > { %v1356_v29 = vpop.f32.mrf.mxu1 }
 0x1f0   : > { %v1357_v55 = vadd.f32 %v1356_v29, %v1314_v54  ;;  %v1315_v1 = vpop.f32.mrf.mxu0 }
 0x1f1   : > { %v1316_v2 = vadd.f32 %v2697_v51, %v1315_v1 }
 0x1f2   : > { %1390 = vst.msk [vmem:[%s2700_s24] sm:$0xff] %vm582_vm2, %v1357_v55 }
 0x1f7   : > { %v1358_v56 = vpop.f32.mrf.mxu1 }
 0x1f8   : > { %v1359_v57 = vadd.f32 %v1358_v56, %v1316_v2  ;;  %v1318_v58 = vpop.f32.mrf.mxu0 }
 0x1f9   : > { %v1319_v59 = vadd.f32 %v2697_v51, %v1318_v58 }
 0x1fa   : > { %1391 = vst.msk [vmem:[%s2700_s24 + $0x8] sm:$0xff] %vm582_vm2, %v1359_v57 }
 0x1ff   : > { %v1361_v60 = vpop.f32.mrf.mxu1 }
 0x200   : > { %v1362_v61 = vadd.f32 %v1361_v60, %v1319_v59  ;;  %v1320_v62 = vpop.f32.mrf.mxu0 }
 0x201   : > { %v1321_v63 = vadd.f32 %v2697_v51, %v1320_v62 }
 0x202   : > { %1392 = vst.msk [vmem:[%s2700_s24 + $0x10] sm:$0xff] %vm582_vm2, %v1362_v61 }
 0x207   : > { %v1363_v0 = vpop.f32.mrf.mxu1 }
 0x208   : > { %v1364_v3 = vadd.f32 %v1363_v0, %v1321_v63  ;;  %v1323_v4 = vpop.f32.mrf.mxu0 }
 0x209   : > { %v1324_v5 = vadd.f32 %v2697_v51, %v1323_v4 }
 0x20a   : > { %1393 = vst.msk [vmem:[%s2700_s24 + $0x18] sm:$0xff] %vm582_vm2, %v1364_v3 }
 0x20f   : > { %v1366_v6 = vpop.f32.mrf.mxu1 }
 0x210   : > { %v1367_v10 = vadd.f32 %v1366_v6, %v1324_v5  ;;  %v1325_v7 = vpop.f32.mrf.mxu0 }
 0x211   : > { %v1326_v11 = vadd.f32 %v2697_v51, %v1325_v7 }
 0x212   : > { %1394 = vst.msk [vmem:[%s2700_s24 + $0x20] sm:$0xff] %vm582_vm2, %v1367_v10 }
 0x217   : > { %v1368_v8 = vpop.f32.mrf.mxu1 }
 0x218   : > { %v1369_v9 = vadd.f32 %v1368_v8, %v1326_v11  ;;  %v1328_v12 = vpop.f32.mrf.mxu0 }
 0x219   : > { %v1329_v13 = vadd.f32 %v2697_v51, %v1328_v12 }
 0x21a   : > { %1395 = vst.msk [vmem:[%s2700_s24 + $0x28] sm:$0xff] %vm582_vm2, %v1369_v9 }
 0x21f   : > { %v1371_v26 = vpop.f32.mrf.mxu1 }
 0x220   : > { %v1372_v27 = vadd.f32 %v1371_v26, %v1329_v13  ;;  %v1330_v14 = vpop.f32.mrf.mxu0 }
 0x221   : > { %v1331_v15 = vadd.f32 %v2697_v51, %v1330_v14 }
 0x222   : > { %1396 = vst.msk [vmem:[%s2700_s24 + $0x30] sm:$0xff] %vm582_vm2, %v1372_v27 }
 0x227   : > { %v1373_v16 = vpop.f32.mrf.mxu1 }
 0x228   : > { %v1374_v17 = vadd.f32 %v1373_v16, %v1331_v15  ;;  %v1333_v18 = vpop.f32.mrf.mxu0 }
 0x229   : > { %v1334_v19 = vadd.f32 %v2697_v51, %v1333_v18 }
 0x22a   : > { %1397 = vst.msk [vmem:[%s2700_s24 + $0x38] sm:$0xff] %vm582_vm2, %v1374_v17 }
 0x22f   : > { %v1376_v20 = vpop.f32.mrf.mxu1 }
 0x230   : > { %v1377_v21 = vadd.f32 %v1376_v20, %v1334_v19  ;;  %v1335_v35 = vpop.f32.mrf.mxu0 }
 0x231   : > { %v1336_v36 = vadd.f32 %v2697_v51, %v1335_v35 }
 0x232   : > { %1398 = vst.msk [vmem:[%s2700_s24 + $0x40] sm:$0xff] %vm582_vm2, %v1377_v21 }
 0x237   : > { %v1378_v47 = vpop.f32.mrf.mxu1 }
 0x238   : > { %v1379_v49 = vadd.f32 %v1378_v47, %v1336_v36  ;;  %v1338_v22 = vpop.f32.mrf.mxu0 }
 0x239   : > { %v1339_v24 = vadd.f32 %v2697_v51, %v1338_v22 }
 0x23a   : > { %1399 = vst.msk [vmem:[%s2700_s24 + $0x48] sm:$0xff] %vm582_vm2, %v1379_v49 }
 0x23f   : > { %v1381_v25 = vpop.f32.mrf.mxu1 }
 0x240   : > { %v1382_v28 = vadd.f32 %v1381_v25, %v1339_v24  ;;  %v1340_v30 = vpop.f32.mrf.mxu0 }
 0x241   : > { %v1341_v31 = vadd.f32 %v2697_v51, %v1340_v30 }
 0x242   : > { %1400 = vst.msk [vmem:[%s2700_s24 + $0x50] sm:$0xff] %vm582_vm2, %v1382_v28 }
 0x247   : > { %v1383_v32 = vpop.f32.mrf.mxu1 }
 0x248   : > { %v1384_v33 = vadd.f32 %v1383_v32, %v1341_v31  ;;  %v1343_v34 = vpop.f32.mrf.mxu0 }
 0x249   : > { %v1344_v37 = vadd.f32 %v2697_v51, %v1343_v34 }
 0x24a   : > { %1401 = vst.msk [vmem:[%s2700_s24 + $0x58] sm:$0xff] %vm582_vm2, %v1384_v33 }
 0x24f   : > { %v1386_v38 = vpop.f32.mrf.mxu1 }
 0x250   : > { %v1387_v39 = vadd.f32 %v1386_v38, %v1344_v37  ;;  %v1345_v40 = vpop.f32.mrf.mxu0 }
 0x252   : > { %1402 = vst.msk [vmem:[%s2700_s24 + $0x60] sm:$0xff] %vm582_vm2, %v1387_v39 }
 0x253   : > { %1409 = sbr.rel (!%p2250_p4) target bundleno = 660 (0x294), region = 60 }
 0x257   : > { %v1388_v41 = vpop.f32.mrf.mxu1 }
 0x258   : > { %s2853_s30 = smov (!%p1412_p8, %s1411_s30), 13 }
 0x259   : > { %s1923_s28 = sshll.u32 %s2853_s30, 3 }
 0x25a   : > { %p1926_p9 = scmp.eq.s32.totalorder %s1923_s28, 0 }
 0x25b   : > { %2081 = sdivrem.u32 (!%p1926_p9), %s2853_s30, 13 }
 0x25c   : > { %1420 = sbr.rel (%p1926_p9) target bundleno = 660 (0x294), region = 64 }
 0x264   : > { %s2753_s17 = spop.drf %2081 }
 0x265   : > { %s2083_s11 = spop.drf %2081  ;;  %p1927_p10 = scmp.le.s32.totalorder %s2753_s17, 0 }
 0x266   : > { %s2844_s12 = smov (!%p1927_p10), %s2747_s27  ;;  %s2845_s20 = smov (!%p1927_p10), %s2700_s24 }
 0x267   : > { %1631 = sbr.rel (%p1927_p10) target bundleno = 634 (0x27a), region = 143  ;;  %s2762_s15 = smov (!%p1927_p10), 0  }
 0x268   : > { %s2764_s18 = smov (!%p1927_p10), 0  }
 0x26c LB: >> { %v1509_v42 = vld [vmem:[%s2149_s20] sm:$0xff]  ;;  %v1511_v43 = vld [vmem:[%s2149_s20 + $0x8] sm:$0xff]  ;;  %v1513_v44 = vld [vmem:[%s2149_s20 + $0x10] sm:$0xff]  ;;  %s1535_s29 = sadd.s32 1, %s2153_s15  ;;  %s1503_s18 = sadd.s32 1, %s2157_s18   ;;  %s2157_s18 = sphi %s2764_s18, %s1503_s18   ;;  %s2153_s15 = sphi %s2762_s15, %s2848_s15   ;;  %s2149_s20 = sphi %s2845_s20, %s2847_s20   ;;  %s2145_s12 = sphi %s2844_s12, %s2846_s12  }
 0x26d   : >> { %1510 = vst [vmem:[%s2145_s12] sm:$0xff] %v1509_v42  ;;  %v1515_v45 = vld [vmem:[%s2149_s20 + $0x18] sm:$0xff]  ;;  %p1536_p11 = scmp.ge.s32.totalorder %s1535_s29, %s2753_s17  ;;  %v1517_v46 = vld [vmem:[%s2149_s20 + $0x20] sm:$0xff]  ;;  %v1519_v48 = vld [vmem:[%s2149_s20 + $0x28] sm:$0xff]  ;;  %p1502_p12 = scmp.ge.s32.totalorder %s1503_s18, %s2753_s17 }
 0x26e   : >> { %1512 = vst [vmem:[%s2145_s12 + $0x8] sm:$0xff] %v1511_v43  ;;  %v1521_v52 = vld [vmem:[%s2149_s20 + $0x30] sm:$0xff]  ;;  %v1523_v50 = vld [vmem:[%s2149_s20 + $0x38] sm:$0xff]  ;;  %v1525_v23 = vld [vmem:[%s2149_s20 + $0x40] sm:$0xff] }
 0x26f   : >> { %1514 = vst [vmem:[%s2145_s12 + $0x10] sm:$0xff] %v1513_v44  ;;  %s2855_s29 = smov (%p1536_p11, %s1535_s29), 0  ;;  %v1527_v53 = vld [vmem:[%s2149_s20 + $0x48] sm:$0xff]  ;;  %v1529_v51 = vld [vmem:[%s2149_s20 + $0x50] sm:$0xff]  ;;  %v1531_v54 = vld [vmem:[%s2149_s20 + $0x58] sm:$0xff] }
 0x270   : >> { %1516 = vst [vmem:[%s2145_s12 + $0x18] sm:$0xff] %v1515_v45  ;;  %s1538_s19 = smul.u32 104, %s2855_s29  ;;  %v1533_v29 = vld [vmem:[%s2149_s20 + $0x60] sm:$0xff]  ;;  %s2848_s15 = smov %s2855_s29 }
 0x271   : >> { %1518 = vst [vmem:[%s2145_s12 + $0x20] sm:$0xff] %v1517_v46 }
 0x272   : >> { %1520 = vst [vmem:[%s2145_s12 + $0x28] sm:$0xff] %v1519_v48  ;;  %s1540_s21 = scalar_lea.vmem %s2700_s24, %s1538_s19 [#allocation2]   ;;  %s1541_s22 = scalar_lea.vmem %s2747_s27, %s1538_s19  }
 0x273   : >> { %1522 = vst [vmem:[%s2145_s12 + $0x30] sm:$0xff] %v1521_v52  ;;  %s2847_s20 = smov %s1540_s21 }
 0x274   : >> { %1524 = vst [vmem:[%s2145_s12 + $0x38] sm:$0xff] %v1523_v50 }
 0x275   : >> { %1526 = vst [vmem:[%s2145_s12 + $0x40] sm:$0xff] %v1525_v23  ;;  %1505 = sbr.rel (!%p1502_p12) target bundleno = 620 (0x26c), region = 149 }
 0x276   : >> { %1528 = vst [vmem:[%s2145_s12 + $0x48] sm:$0xff] %v1527_v53 }
 0x277   : >> { %1530 = vst [vmem:[%s2145_s12 + $0x50] sm:$0xff] %v1529_v51 }
 0x278   : >> { %1532 = vst [vmem:[%s2145_s12 + $0x58] sm:$0xff] %v1531_v54 }
 0x279   : >> { %1534 = vst [vmem:[%s2145_s12 + $0x60] sm:$0xff] %v1533_v29  ;;  %s2846_s12 = smov %s1541_s22 }
 0x27a PF: > { %2084 = sdivrem.u32 %s2853_s30, 13 }
 0x27b   : > { %s1928_s23 = smul.u32 104, %s2753_s17 }
 0x27d   : > { %s2818_s14 = scalar_lea.vmem %s2700_s24, %s1928_s23 [#allocation2]   ;;  %s1548_s25 = scalar_lea.vmem %s2747_s27, %s1928_s23  }
 0x283   : > { %s2085_s26 = spop.drf %2084 }
 0x284   : > { %s2086_s28 = spop.drf %2084 }
 0x285   : > { %p1930_p13 = scmp.le.s32.totalorder %s2086_s28, 0 }
 0x286   : > { %s2159_s11 = smov (!%p1930_p13), %s1548_s25   ;;  %s2163_s29 = smov (!%p1930_p13), %s2818_s14  }
 0x287   : > { %1645 = sbr.rel (%p1930_p13) target bundleno = 660 (0x294), region = 154  ;;  %s2167_s19 = smov (!%p1930_p13), 0  }
 0x288   : > { %s2171_s18 = smov (!%p1930_p13), 0  }
 0x28c LB: >> { %v1558_v55 = vld [vmem:[%s2165_s29] sm:$0xff]  ;;  %s1560_s24 = sadd.s32 1, %s2169_s19  ;;  %s1552_s18 = sadd.s32 1, %s2173_s18   ;;  %s2173_s18 = sphi %s2171_s18, %s1552_s18   ;;  %s2169_s19 = sphi %s2167_s19, %s2168_s19   ;;  %s2165_s29 = sphi %s2163_s29, %s1565_s29   ;;  %s2161_s11 = sphi %s2159_s11, %s1566_s11  }
 0x28d   : >> { %1559 = vst [vmem:[%s2161_s11] sm:$0xff] %v1558_v55  ;;  %p1561_p0 = scmp.ge.s32.totalorder %s1560_s24, %s2086_s28  ;;  %p1551_p1 = scmp.ge.s32.totalorder %s1552_s18, %s2086_s28 }
 0x28f   : >> { %s2857_s24 = smov (%p1561_p0, %s1560_s24), 0  ;;  %1554 = sbr.rel (!%p1551_p1) target bundleno = 652 (0x28c), region = 160 }
 0x290   : >> { %s1931_s30 = sshll.u32 %s2857_s24, 3  ;;  %s2168_s19 = smov %s2857_s24  }
 0x291   : >> { %s1565_s29 = scalar_lea.vmem %s2818_s14, %s1931_s30 [#allocation2]   ;;  %s1566_s11 = scalar_lea.vmem %s1548_s25, %s1931_s30  }
 0x294 PF: > { %p16_p2 = scmp.ge.s32.totalorder %s2240_s13, 4   ;;  %s2849_s30 = smov %s2137_s10 }
 0x295   : > { %s2850_s10 = smov %s2248_s16  ;;  %s2851_s11 = smov %s2240_s13 }
 0x296   :  { %18 = sbr.rel (!%p16_p2) target bundleno = 2 (0x2), region = 171 }

</bundles_post_ra>
